<compile_context>
chip_gen: v5e
topology: v5e:2x2
jax: 0.10.0
libtpu: 0.0.40
codegen_flags: <defaults>
</compile_context>

<pallas_src>
import math
from functools import partial

import numpy as np
import jax
import jax.numpy as jnp
from jax.experimental import pallas as pl
from jax.experimental.pallas import tpu as pltpu

# -----------------------------------------------------------------------------
# Model hyper-parameters (small shapes consistent with HQNN_Quanv.__init__)
# -----------------------------------------------------------------------------
IN_CHANNELS = 1
NUM_CLASSES = 3
INPUT_SIZE = (1, 8, 8)      # (C, H, W)
QUANV_K = 2
QUANV_S = 2
QUANV_P = 0
POOL_K = 2
NUM_QREPS = 2
BATCH = 2

NQ = IN_CHANNELS * QUANV_K * QUANV_K     # num_qubits == C*k*k == 4
DIM = 2 ** NQ                            # statevector dimension == 16
BN_EPS = 1e-5
LANE = 128                               # TPU lane width (pad patch axis to this)

# TODO(synk): only the BEL ansatz (BasicEntanglerLayers w/ RZ rotations) is
#             instantiated; SEL / RL would need their own unitary builders.
# TODO(synk): BatchNorm2d is applied in eval mode with default running stats;
#             training-mode batch statistics are not reproduced.


def _round_up(x, m):
    return -(-x // m) * m


# Constant-slab row layout (module-level so kernel offsets are static Python
# ints): quadratic forms, then FC weight, then FC bias (each 8-row aligned).
SLAB_W_ROW = _round_up(NQ * DIM, 8)
SLAB_B_ROW = SLAB_W_ROW + _round_up(NUM_CLASSES, 8)
SLAB_ROWS = SLAB_B_ROW + _round_up(NUM_CLASSES, 8)


# -----------------------------------------------------------------------------
# Host-side (glue) quantum-circuit constant construction
# -----------------------------------------------------------------------------
def _single_qubit_op(gate, wire, n):
    # wire 0 = most-significant bit (PennyLane convention)
    return np.kron(np.kron(np.eye(2 ** wire), gate), np.eye(2 ** (n - 1 - wire)))


def _cnot(control, target, n):
    d = 2 ** n
    m = np.zeros((d, d), dtype=np.complex128)
    for j in range(d):
        j2 = j ^ (1 << (n - 1 - target)) if (j >> (n - 1 - control)) & 1 else j
        m[j2, j] = 1.0
    return m


def _rz(theta):
    return np.diag([np.exp(-0.5j * theta), np.exp(0.5j * theta)]).astype(np.complex128)


def build_ansatz_unitary(weights, n):
    """BasicEntanglerLayers: per-layer RZ rotations + closed CNOT ring."""
    d = 2 ** n
    u = np.eye(d, dtype=np.complex128)
    for layer in range(weights.shape[0]):
        lu = np.eye(d, dtype=np.complex128)
        for w in range(n):
            lu = _single_qubit_op(_rz(weights[layer, w]), w, n) @ lu
        if n == 2:
            lu = _cnot(0, 1, n) @ lu
        elif n > 2:
            for w in range(n):
                lu = _cnot(w, (w + 1) % n, n) @ lu
        u = lu @ u
    return u


def build_folded_qcat_t(qweights, bn_scale_vec, bn_bias_vec):
    """Stacked quadratic forms (NQ*DIM, DIM), rows k*DIM:(k+1)*DIM equal
         A_k = scale_k * Re( P^H (U^H Y_k U) P ) + bias_k * I,
    with P = diag((-i)^popcount(j)) the RX-embedding phase.  Because
    sum_j |psi_j|^2 == 1, folding the BatchNorm bias as bias_k*I is exact, so
    the kernel only needs one MXU dot + elementwise work (no bias operand)."""
    n, d = NQ, DIM
    u = build_ansatz_unitary(np.asarray(qweights, dtype=np.float64), n)
    pauli_y = np.array([[0.0, -1.0j], [1.0j, 0.0]], dtype=np.complex128)
    j = np.arange(d)
    bits = np.stack([(j >> (n - 1 - w)) & 1 for w in range(n)])
    phase = (-1.0j) ** bits.sum(axis=0)                       # phase of prod RX|0>
    blocks = []
    for k in range(n):
        m = u.conj().T @ _single_qubit_op(pauli_y, k, n) @ u  # U^H Y_k U (Hermitian)
        a = np.conj(phase)[:, None] * m * phase[None, :]      # fold embedding phase
        a_k = float(bn_scale_vec[k]) * np.real(a) + float(bn_bias_vec[k]) * np.eye(d)
        blocks.append(a_k)                                    # fold BN scale + bias
    return np.concatenate(blocks, axis=0).astype(np.float32)  # (NQ*DIM, DIM)


def permute_fc_weight_t(fc_w, hp, wp):
    """Torch flattens NCHW (feature = q*hp*wp + r); the kernel flattens NHWC
    (feature = r*NQ + q) with the batch on lanes, so permute the FC weight
    rows and transpose on the host -> (NUM_CLASSES, hp*wp*NQ)."""
    w = np.asarray(fc_w, dtype=np.float32).reshape(NQ, hp * wp, NUM_CLASSES)
    w = np.ascontiguousarray(w.transpose(1, 0, 2)).reshape(hp * wp * NQ, NUM_CLASSES)
    return np.ascontiguousarray(w.T)


def build_const_slab(qweights, bn_scale_vec, bn_bias_vec, fc_w, fc_b, hp, wp):
    """Pack ALL constant operands into one lane-aligned f32 slab (single DMA):
       rows [0, NQ*DIM)                 cols [0, DIM)        : stacked A_k
       rows [SLAB_W_ROW, +NUM_CLASSES)  cols [0, hp*wp*NQ)   : permuted FC weight^T
       rows [SLAB_B_ROW, +NUM_CLASSES)  col 0                : FC bias"""
    qcat_t = build_folded_qcat_t(qweights, bn_scale_vec, bn_bias_vec)
    wfc_t = permute_fc_weight_t(fc_w, hp, wp)
    feat = hp * wp * NQ
    lanew = max(DIM, feat)
    slab = np.zeros((SLAB_ROWS, lanew), np.float32)
    slab[:NQ * DIM, :DIM] = qcat_t
    slab[SLAB_W_ROW:SLAB_W_ROW + NUM_CLASSES, :feat] = wfc_t
    slab[SLAB_B_ROW:SLAB_B_ROW + NUM_CLASSES, 0] = np.asarray(fc_b, np.float32).reshape(-1)
    return slab


# -----------------------------------------------------------------------------
# Fused Pallas kernel: TanhScale + Quanv + BN (folded) + ReLU + MaxPool + FC
# -----------------------------------------------------------------------------
def _hqnn_fused_kernel(x_ref, slab_ref, out_ref, *, nq, dim, pool_sq, groups,
                       batch, n_pool_out, n_classes, w_row, b_row):
    # x_ref:    (nq, P_pad) raw patch pixels with the patch index on LANES:
    #              lane = (di*pool_k + dj)*groups + (i*wp + j)*batch + b
    #           (zero-padded to a multiple of 128; padded lanes never reach the
    #            pool / FC slices below)
    # slab_ref: packed constants (see build_const_slab)
    # out_ref:  (n_classes, batch) -- batch on lanes; wrapper transposes
    x = jnp.tanh(x_ref[...]) * (math.pi / 2.0)                # TanhScale (fused)
    half = 0.5 * x
    cosv = jnp.cos(half)                                      # (nq, P)
    sinv = jnp.sin(half)

    # |psi_j| = prod_w (cos if bit_w(j)==0 else sin); lane-dense (dim, P).
    # Bit masks are trace-time constants from an iota (no DMA'd tables).
    j_idx = jax.lax.broadcasted_iota(jnp.int32, (dim, 1), 0)  # (dim, 1)
    mag = None
    for w in range(nq):
        bit_set = (j_idx & (1 << (nq - 1 - w))) != 0
        sel = jnp.where(bit_set, sinv[w:w + 1, :], cosv[w:w + 1, :])   # (dim, P)
        mag = sel if mag is None else mag * sel

    # <psi| U^H Y_k U |psi> for all k (BN scale+bias already folded into A_k):
    # ONE lane-dense MXU dot against the stacked quadratic forms, then per-k
    # sublane-slab multiply + sublane reduction (XLU) -- no selector matrix,
    # no cross-lane concatenation.
    qcat = slab_ref[0:nq * dim, 0:dim]                                  # (nq*dim, dim)
    mq = jnp.dot(qcat, mag, preferred_element_type=jnp.float32)         # (nq*dim, P)
    ev_rows = []
    for k in range(nq):
        quad = mq[k * dim:(k + 1) * dim, :] * mag                       # (dim, P)
        ev_rows.append(jnp.sum(quad, axis=0, keepdims=True))            # (1, P)
    y = jnp.maximum(jnp.concatenate(ev_rows, axis=0), 0.0)              # ReLU, (nq, P)

    # MaxPool2d: pool-window offset is the outermost lane block, so pooling is
    # a max over pool_sq contiguous lane blocks of width `groups`.
    pooled = y[:, 0:groups]
    for t in range(1, pool_sq):
        pooled = jnp.maximum(pooled, y[:, t * groups:(t + 1) * groups])  # (nq, groups)

    # Flatten (NHWC order; FC weight rows were permuted/transposed on host)
    # + Linear, emitted with the batch axis on lanes.
    flat_t = jnp.concatenate(
        [pooled[:, r * batch:(r + 1) * batch] for r in range(n_pool_out)], axis=0)
    wfc = slab_ref[w_row:w_row + n_classes, 0:n_pool_out * nq]          # (ncls, feat)
    bfc = slab_ref[b_row:b_row + n_classes, 0:1]                        # (ncls, 1)
    out_ref[...] = jnp.dot(wfc, flat_t, preferred_element_type=jnp.float32) + bfc


_VMEM = pl.BlockSpec(memory_space=pltpu.MemorySpace.VMEM)


def hqnn_fused_call(patches_t, slab, *, batch, hp, wp):
    groups = batch * hp * wp
    kernel = partial(_hqnn_fused_kernel, nq=NQ, dim=DIM, pool_sq=POOL_K * POOL_K,
                     groups=groups, batch=batch, n_pool_out=hp * wp,
                     n_classes=NUM_CLASSES, w_row=SLAB_W_ROW, b_row=SLAB_B_ROW)
    # TODO(synk): at larger batch/image sizes, add a grid over the lane (patch)
    #             axis marked "parallel" in dimension_semantics (v7x: shards
    #             across the 2 TensorCores), accumulate the FC partials across
    #             steps, and re-derive tile sizes per generation's scoped VMEM
    #             (v5e 16 MiB / v6e 32 MiB / v7x 32 of 64 MiB, set
    #             vmem_limit_bytes explicitly).  At these tiny shapes a
    #             gridless, fully VMEM-resident call is fastest (grid steps
    #             cost ~0.35 us each).
    out_t = pl.pallas_call(
        kernel,
        out_shape=jax.ShapeDtypeStruct((NUM_CLASSES, batch), jnp.float32),
        in_specs=[_VMEM, _VMEM],
        out_specs=_VMEM,
    )(patches_t, slab)
    return out_t.T                       # (batch, NUM_CLASSES)


# -----------------------------------------------------------------------------
# Forward pass (glue: patch extraction / host-side constant folding)
# -----------------------------------------------------------------------------
def extract_patches_lane_major(x):
    """x: (B, 1, H, W) -> (NQ, P_pad) patch matrix with the patch index on the
    LANE axis, ordered (pool-offset, pooled-position, batch) so the in-kernel
    max-pool reduces contiguous lane blocks and the flatten keeps batch lanes
    contiguous; lanes are zero-padded up to a multiple of 128."""
    b, c, h, w = x.shape
    assert c == IN_CHANNELS == 1
    if QUANV_P > 0:
        x = jnp.pad(x, ((0, 0), (0, 0), (QUANV_P,) * 2, (QUANV_P,) * 2))
        h, w = h + 2 * QUANV_P, w + 2 * QUANV_P
    ho = (h - QUANV_K) // QUANV_S + 1
    wo = (w - QUANV_K) // QUANV_S + 1
    hp = (ho - POOL_K) // POOL_K + 1
    wp = (wo - POOL_K) // POOL_K + 1
    cols = []
    for ki in range(QUANV_K):
        for kj in range(QUANV_K):
            cols.append(x[:, 0,
                          ki:ki + QUANV_S * (ho - 1) + 1:QUANV_S,
                          kj:kj + QUANV_S * (wo - 1) + 1:QUANV_S])
    patches = jnp.stack(cols, axis=-1)                        # (B, ho, wo, NQ)
    patches = patches[:, :hp * POOL_K, :wp * POOL_K, :]       # crop to pooled extent
    patches = patches.reshape(b, hp, POOL_K, wp, POOL_K, NQ)
    patches = patches.transpose(5, 2, 4, 1, 3, 0)             # (NQ, PK, PK, hp, wp, B)
    p = POOL_K * POOL_K * hp * wp * b
    flat_t = patches.reshape(NQ, p)
    p_pad = _round_up(p, LANE)
    if p_pad != p:
        flat_t = jnp.pad(flat_t, ((0, 0), (0, p_pad - p)))
    return flat_t, hp, wp


@jax.jit
def hqnn_quanv_forward(x, slab):
    b = x.shape[0]
    patches_t, hp, wp = extract_patches_lane_major(x)
    return hqnn_fused_call(patches_t, slab, batch=b, hp=hp, wp=wp)


# -----------------------------------------------------------------------------
# Pure-numpy reference (statevector simulation) for a sanity check
# -----------------------------------------------------------------------------
def reference_forward(x, qweights, bn_scale, bn_bias, fc_w, fc_b):
    x = np.asarray(x, dtype=np.float64)
    u = build_ansatz_unitary(np.asarray(qweights, np.float64), NQ)
    pauli_y = np.array([[0.0, -1.0j], [1.0j, 0.0]], dtype=np.complex128)
    y_ops = [_single_qubit_op(pauli_y, k, NQ) for k in range(NQ)]
    b = x.shape[0]
    xt = np.tanh(x) * (np.pi / 2.0)
    h, w = xt.shape[2], xt.shape[3]
    ho = (h - QUANV_K) // QUANV_S + 1
    wo = (w - QUANV_K) // QUANV_S + 1
    cols = []
    for di in range(QUANV_K):
        for dj in range(QUANV_K):
            cols.append(xt[:, 0,
                           di:di + QUANV_S * (ho - 1) + 1:QUANV_S,
                           dj:dj + QUANV_S * (wo - 1) + 1:QUANV_S])
    flat = np.stack(cols, axis=-1).reshape(-1, NQ)
    half = 0.5 * flat
    c, s = np.cos(half), np.sin(half)
    j = np.arange(DIM)
    bits = np.stack([(j >> (NQ - 1 - wi)) & 1 for wi in range(NQ)])
    mag = np.prod(np.where(bits[None] == 1, s[:, :, None], c[:, :, None]), axis=1)
    psi = mag * ((-1.0j) ** bits.sum(axis=0))[None, :]
    psi = psi @ u.T
    ev = np.stack([np.real(np.sum(np.conj(psi) * (psi @ y_ops[k].T), axis=-1))
                   for k in range(NQ)], axis=-1)
    y = np.maximum(ev * np.asarray(bn_scale, np.float64)
                   + np.asarray(bn_bias, np.float64), 0.0)
    feat = y.reshape(b, ho, wo, NQ).transpose(0, 3, 1, 2)
    hp = (ho - POOL_K) // POOL_K + 1
    wp = (wo - POOL_K) // POOL_K + 1
    pooled = (feat[:, :, :hp * POOL_K, :wp * POOL_K]
              .reshape(b, NQ, hp, POOL_K, wp, POOL_K).max(axis=(3, 5)))
    return pooled.reshape(b, -1) @ np.asarray(fc_w, np.float64) + np.asarray(fc_b, np.float64)


# -----------------------------------------------------------------------------
if __name__ == "__main__":
    key = jax.random.PRNGKey(0)
    kx, kq, kw, kb = jax.random.split(key, 4)
    x = jax.random.normal(kx, (BATCH, IN_CHANNELS, INPUT_SIZE[1], INPUT_SIZE[2]),
                          dtype=jnp.float32)

    # quantum ansatz weights: BasicEntanglerLayers shape = (num_qreps, num_qubits)
    qweights = jax.random.uniform(kq, (NUM_QREPS, NQ), minval=0.0,
                                  maxval=2.0 * math.pi, dtype=jnp.float32)

    # BatchNorm2d (eval mode, default init: gamma=1, beta=0, mean=0, var=1)
    gamma = np.ones(NQ, np.float32)
    beta = np.zeros(NQ, np.float32)
    r_mean = np.zeros(NQ, np.float32)
    r_var = np.ones(NQ, np.float32)
    bn_scale_vec = (gamma / np.sqrt(r_var + BN_EPS)).astype(np.float32)
    bn_bias_vec = (beta - r_mean * bn_scale_vec).astype(np.float32)

    # fc (torch Linear default init); stored transposed as (in_features, out_features)
    h = (INPUT_SIZE[1] + 2 * QUANV_P - QUANV_K) // QUANV_S + 1
    w = (INPUT_SIZE[2] + 2 * QUANV_P - QUANV_K) // QUANV_S + 1
    hp = (h - POOL_K) // POOL_K + 1
    wp = (w - POOL_K) // POOL_K + 1
    flat_dim = NQ * hp * wp
    bound = 1.0 / math.sqrt(flat_dim)
    fc_w = jax.random.uniform(kw, (flat_dim, NUM_CLASSES), minval=-bound,
                              maxval=bound, dtype=jnp.float32)
    fc_b = jax.random.uniform(kb, (1, NUM_CLASSES), minval=-bound,
                              maxval=bound, dtype=jnp.float32)

    # Host-side folding: embedding phase + BN scale + BN bias into the quadratic
    # forms, FC weight permutation/transposition, and packing of every constant
    # operand into ONE lane-aligned slab (single DMA into the kernel).
    slab = build_const_slab(np.asarray(qweights), bn_scale_vec, bn_bias_vec,
                            np.asarray(fc_w), np.asarray(fc_b), hp, wp)

    out = hqnn_quanv_forward(x, jnp.asarray(slab))
    out = jax.block_until_ready(out)

    ref = reference_forward(np.asarray(x), np.asarray(qweights),
                            bn_scale_vec.reshape(1, NQ), bn_bias_vec.reshape(1, NQ),
                            np.asarray(fc_w), np.asarray(fc_b))
    # Tightened from 2e-2 so layout / permutation regressions are caught.
    np.testing.assert_allclose(np.asarray(out), ref, rtol=1e-4, atol=1e-4)
    print("KERNEL_OK")
</pallas_src>

<mosaic_0001>
module attributes {stable_mosaic.version = 11 : i64} {
  func.func @_hqnn_fused_kernel(%arg0: memref<4x128xf32, #tpu.memory_space<vmem>>, %arg1: memref<80x16xf32, #tpu.memory_space<vmem>>, %arg2: memref<3x2xf32, #tpu.memory_space<vmem>>) attributes {dimension_semantics = [], scalar_prefetch = 0 : i64, scratch_operands = 0 : i64, tpu.core_type = #tpu.core_type<tc>} {
    %c0 = arith.constant 0 : index
    %c0_0 = arith.constant 0 : index
    %0 = vector.load %arg0[%c0, %c0_0] : memref<4x128xf32, #tpu.memory_space<vmem>>, vector<4x128xf32>
    %1 = math.tanh %0 : vector<4x128xf32>
    %cst = arith.constant 1.57079637 : f32
    %2 = vector.broadcast %cst : f32 to vector<4x128xf32>
    %3 = arith.mulf %1, %2 : vector<4x128xf32>
    %cst_1 = arith.constant 5.000000e-01 : f32
    %4 = vector.broadcast %cst_1 : f32 to vector<4x128xf32>
    %5 = arith.mulf %4, %3 : vector<4x128xf32>
    %6 = math.cos %5 : vector<4x128xf32>
    %7 = math.sin %5 : vector<4x128xf32>
    %8 = tpu.iota {dimensions = array<i32: 0>} : vector<16x1xi32>
    %c8_i32 = arith.constant 8 : i32
    %9 = vector.broadcast %c8_i32 : i32 to vector<16x1xi32>
    %10 = arith.andi %8, %9 : vector<16x1xi32>
    %c0_i32 = arith.constant 0 : i32
    %11 = vector.broadcast %c0_i32 : i32 to vector<16x1xi32>
    %12 = arith.cmpi ne, %10, %11 : vector<16x1xi32>
    %13 = vector.extract_strided_slice %7 {offsets = [0, 0], sizes = [1, 128], strides = [1, 1]} : vector<4x128xf32> to vector<1x128xf32>
    %14 = vector.extract_strided_slice %6 {offsets = [0, 0], sizes = [1, 128], strides = [1, 1]} : vector<4x128xf32> to vector<1x128xf32>
    %15 = vector.shape_cast %12 : vector<16x1xi1> to vector<16x1xi1>
    %16 = vector.broadcast %15 : vector<16x1xi1> to vector<16x128xi1>
    %17 = vector.shape_cast %13 : vector<1x128xf32> to vector<1x128xf32>
    %18 = vector.broadcast %17 : vector<1x128xf32> to vector<16x128xf32>
    %19 = vector.shape_cast %14 : vector<1x128xf32> to vector<1x128xf32>
    %20 = vector.broadcast %19 : vector<1x128xf32> to vector<16x128xf32>
    %21 = arith.select %16, %18, %20 : vector<16x128xi1>, vector<16x128xf32>
    %c4_i32 = arith.constant 4 : i32
    %22 = vector.broadcast %c4_i32 : i32 to vector<16x1xi32>
    %23 = arith.andi %8, %22 : vector<16x1xi32>
    %c0_i32_2 = arith.constant 0 : i32
    %24 = vector.broadcast %c0_i32_2 : i32 to vector<16x1xi32>
    %25 = arith.cmpi ne, %23, %24 : vector<16x1xi32>
    %26 = vector.extract_strided_slice %7 {offsets = [1, 0], sizes = [1, 128], strides = [1, 1]} : vector<4x128xf32> to vector<1x128xf32>
    %27 = vector.extract_strided_slice %6 {offsets = [1, 0], sizes = [1, 128], strides = [1, 1]} : vector<4x128xf32> to vector<1x128xf32>
    %28 = vector.shape_cast %25 : vector<16x1xi1> to vector<16x1xi1>
    %29 = vector.broadcast %28 : vector<16x1xi1> to vector<16x128xi1>
    %30 = vector.shape_cast %26 : vector<1x128xf32> to vector<1x128xf32>
    %31 = vector.broadcast %30 : vector<1x128xf32> to vector<16x128xf32>
    %32 = vector.shape_cast %27 : vector<1x128xf32> to vector<1x128xf32>
    %33 = vector.broadcast %32 : vector<1x128xf32> to vector<16x128xf32>
    %34 = arith.select %29, %31, %33 : vector<16x128xi1>, vector<16x128xf32>
    %35 = arith.mulf %21, %34 : vector<16x128xf32>
    %c2_i32 = arith.constant 2 : i32
    %36 = vector.broadcast %c2_i32 : i32 to vector<16x1xi32>
    %37 = arith.andi %8, %36 : vector<16x1xi32>
    %c0_i32_3 = arith.constant 0 : i32
    %38 = vector.broadcast %c0_i32_3 : i32 to vector<16x1xi32>
    %39 = arith.cmpi ne, %37, %38 : vector<16x1xi32>
    %40 = vector.extract_strided_slice %7 {offsets = [2, 0], sizes = [1, 128], strides = [1, 1]} : vector<4x128xf32> to vector<1x128xf32>
    %41 = vector.extract_strided_slice %6 {offsets = [2, 0], sizes = [1, 128], strides = [1, 1]} : vector<4x128xf32> to vector<1x128xf32>
    %42 = vector.shape_cast %39 : vector<16x1xi1> to vector<16x1xi1>
    %43 = vector.broadcast %42 : vector<16x1xi1> to vector<16x128xi1>
    %44 = vector.shape_cast %40 : vector<1x128xf32> to vector<1x128xf32>
    %45 = vector.broadcast %44 : vector<1x128xf32> to vector<16x128xf32>
    %46 = vector.shape_cast %41 : vector<1x128xf32> to vector<1x128xf32>
    %47 = vector.broadcast %46 : vector<1x128xf32> to vector<16x128xf32>
    %48 = arith.select %43, %45, %47 : vector<16x128xi1>, vector<16x128xf32>
    %49 = arith.mulf %35, %48 : vector<16x128xf32>
    %c1_i32 = arith.constant 1 : i32
    %50 = vector.broadcast %c1_i32 : i32 to vector<16x1xi32>
    %51 = arith.andi %8, %50 : vector<16x1xi32>
    %c0_i32_4 = arith.constant 0 : i32
    %52 = vector.broadcast %c0_i32_4 : i32 to vector<16x1xi32>
    %53 = arith.cmpi ne, %51, %52 : vector<16x1xi32>
    %54 = vector.extract_strided_slice %7 {offsets = [3, 0], sizes = [1, 128], strides = [1, 1]} : vector<4x128xf32> to vector<1x128xf32>
    %55 = vector.extract_strided_slice %6 {offsets = [3, 0], sizes = [1, 128], strides = [1, 1]} : vector<4x128xf32> to vector<1x128xf32>
    %56 = vector.shape_cast %53 : vector<16x1xi1> to vector<16x1xi1>
    %57 = vector.broadcast %56 : vector<16x1xi1> to vector<16x128xi1>
    %58 = vector.shape_cast %54 : vector<1x128xf32> to vector<1x128xf32>
    %59 = vector.broadcast %58 : vector<1x128xf32> to vector<16x128xf32>
    %60 = vector.shape_cast %55 : vector<1x128xf32> to vector<1x128xf32>
    %61 = vector.broadcast %60 : vector<1x128xf32> to vector<16x128xf32>
    %62 = arith.select %57, %59, %61 : vector<16x128xi1>, vector<16x128xf32>
    %63 = arith.mulf %49, %62 : vector<16x128xf32>
    %c0_5 = arith.constant 0 : index
    %c0_6 = arith.constant 0 : index
    %64 = vector.load %arg1[%c0_5, %c0_6] : memref<80x16xf32, #tpu.memory_space<vmem>>, vector<64x16xf32>
    %cst_7 = arith.constant dense<0.000000e+00> : vector<64x128xf32>
    %65 = tpu.matmul %64, %63, %cst_7 {dimension_numbers = #tpu.dot_dimension_numbers<[1], [0], [0], [1], [0, 0, 1, 1], [], []>} : vector<64x16xf32>, vector<16x128xf32>, vector<64x128xf32> -> vector<64x128xf32>
    %66 = vector.extract_strided_slice %65 {offsets = [0, 0], sizes = [16, 128], strides = [1, 1]} : vector<64x128xf32> to vector<16x128xf32>
    %67 = arith.mulf %66, %63 : vector<16x128xf32>
    %cst_8 = arith.constant dense<0.000000e+00> : vector<128xf32>
    %68 = vector.multi_reduction <add>, %67, %cst_8 [0] : vector<16x128xf32> to vector<128xf32>
    %69 = vector.shape_cast %68 : vector<128xf32> to vector<1x128xf32>
    %70 = vector.extract_strided_slice %65 {offsets = [16, 0], sizes = [16, 128], strides = [1, 1]} : vector<64x128xf32> to vector<16x128xf32>
    %71 = arith.mulf %70, %63 : vector<16x128xf32>
    %cst_9 = arith.constant dense<0.000000e+00> : vector<128xf32>
    %72 = vector.multi_reduction <add>, %71, %cst_9 [0] : vector<16x128xf32> to vector<128xf32>
    %73 = vector.shape_cast %72 : vector<128xf32> to vector<1x128xf32>
    %74 = vector.extract_strided_slice %65 {offsets = [32, 0], sizes = [16, 128], strides = [1, 1]} : vector<64x128xf32> to vector<16x128xf32>
    %75 = arith.mulf %74, %63 : vector<16x128xf32>
    %cst_10 = arith.constant dense<0.000000e+00> : vector<128xf32>
    %76 = vector.multi_reduction <add>, %75, %cst_10 [0] : vector<16x128xf32> to vector<128xf32>
    %77 = vector.shape_cast %76 : vector<128xf32> to vector<1x128xf32>
    %78 = vector.extract_strided_slice %65 {offsets = [48, 0], sizes = [16, 128], strides = [1, 1]} : vector<64x128xf32> to vector<16x128xf32>
    %79 = arith.mulf %78, %63 : vector<16x128xf32>
    %cst_11 = arith.constant dense<0.000000e+00> : vector<128xf32>
    %80 = vector.multi_reduction <add>, %79, %cst_11 [0] : vector<16x128xf32> to vector<128xf32>
    %81 = vector.shape_cast %80 : vector<128xf32> to vector<1x128xf32>
    %82 = tpu.concatenate %69, %73, %77, %81 in 0 : vector<1x128xf32>, vector<1x128xf32>, vector<1x128xf32>, vector<1x128xf32> -> vector<4x128xf32>
    %cst_12 = arith.constant 0.000000e+00 : f32
    %83 = vector.broadcast %cst_12 : f32 to vector<4x128xf32>
    %84 = arith.maximumf %82, %83 : vector<4x128xf32>
    %85 = vector.extract_strided_slice %84 {offsets = [0, 0], sizes = [4, 8], strides = [1, 1]} : vector<4x128xf32> to vector<4x8xf32>
    %86 = vector.extract_strided_slice %84 {offsets = [0, 8], sizes = [4, 8], strides = [1, 1]} : vector<4x128xf32> to vector<4x8xf32>
    %87 = arith.maximumf %85, %86 : vector<4x8xf32>
    %88 = vector.extract_strided_slice %84 {offsets = [0, 16], sizes = [4, 8], strides = [1, 1]} : vector<4x128xf32> to vector<4x8xf32>
    %89 = arith.maximumf %87, %88 : vector<4x8xf32>
    %90 = vector.extract_strided_slice %84 {offsets = [0, 24], sizes = [4, 8], strides = [1, 1]} : vector<4x128xf32> to vector<4x8xf32>
    %91 = arith.maximumf %89, %90 : vector<4x8xf32>
    %92 = vector.extract_strided_slice %91 {offsets = [0, 0], sizes = [4, 2], strides = [1, 1]} : vector<4x8xf32> to vector<4x2xf32>
    %93 = vector.extract_strided_slice %91 {offsets = [0, 2], sizes = [4, 2], strides = [1, 1]} : vector<4x8xf32> to vector<4x2xf32>
    %94 = vector.extract_strided_slice %91 {offsets = [0, 4], sizes = [4, 2], strides = [1, 1]} : vector<4x8xf32> to vector<4x2xf32>
    %95 = vector.extract_strided_slice %91 {offsets = [0, 6], sizes = [4, 2], strides = [1, 1]} : vector<4x8xf32> to vector<4x2xf32>
    %96 = tpu.concatenate %92, %93, %94, %95 in 0 : vector<4x2xf32>, vector<4x2xf32>, vector<4x2xf32>, vector<4x2xf32> -> vector<16x2xf32>
    %c64 = arith.constant 64 : index
    %c0_13 = arith.constant 0 : index
    %97 = vector.load %arg1[%c64, %c0_13] : memref<80x16xf32, #tpu.memory_space<vmem>>, vector<3x16xf32>
    %c72 = arith.constant 72 : index
    %c0_14 = arith.constant 0 : index
    %98 = vector.load %arg1[%c72, %c0_14] : memref<80x16xf32, #tpu.memory_space<vmem>>, vector<3x1xf32>
    %cst_15 = arith.constant dense<0.000000e+00> : vector<3x2xf32>
    %99 = tpu.matmul %97, %96, %cst_15 {dimension_numbers = #tpu.dot_dimension_numbers<[1], [0], [0], [1], [0, 0, 1, 1], [], []>} : vector<3x16xf32>, vector<16x2xf32>, vector<3x2xf32> -> vector<3x2xf32>
    %100 = vector.broadcast %98 : vector<3x1xf32> to vector<3x2xf32>
    %101 = arith.addf %99, %100 : vector<3x2xf32>
    %c0_16 = arith.constant 0 : index
    %c0_17 = arith.constant 0 : index
    %102 = vector.load %arg2[%c0_16, %c0_17] : memref<3x2xf32, #tpu.memory_space<vmem>>, vector<3x2xf32>
    tpu.vector_store %arg2[%c0_16, %c0_17], %101 {strides = array<i32>} : memref<3x2xf32, #tpu.memory_space<vmem>>, vector<3x2xf32>,
    return
  }
}

</mosaic_0001>

<bundles_post_ra>
// kernel: hqnn_quanv_forward.1
= control target key start
LH: loop header
LB: loop body
LE: loop exit
PB: predicated region body
PF: predicated region fallthrough
CT: control target
= control target key end

     0   :  { %v596_v3 = vmov 0   ;;  %v597_v16 = vmov 683565275   ;;  %v598_v18 = vmov 2475754826   ;;  %s603_s26 = smov 104   ;;  %s753_s0 = inlined_call_operand.vmem [shape: f32[4,128], index: 0, kind: input, shape index: {}]   ;;  %s754_s1 = inlined_call_operand.vmem [shape: f32[80,16], index: 1, kind: input, shape index: {}]   ;;  %s755_s2 = inlined_call_operand.vmem [shape: f32[3,2], index: 2, kind: output, shape index: {}]  }
   0x1   :  { %v11_v0 = vld [vmem:[%s753_s0] sm:$0xf]  ;;  %593 = vset.pattern.permute.xlu0 %v596_v3  ;;  %v599_v20 = vmov 2131351028   ;;  %v600_v22 = vmov 2102212464  }
   0x2   :  { %594 = vtanh.f32 %v11_v0  ;;  %v601_v24 = vmov 920167782   ;;  %v602_v30 = vmov 1326507024   ;;  %s604_s27 = smov 120   ;;  %s605_s28 = smov 112  }
   0x3   :  { %s606_s29 = smov 124   ;;  %s607_s30 = smov 122  }
   0x4   :  { %s608_s3 = smov 126  }
   0x8   :  { %v595_v1 = vpop.eup %594 }
   0x9   :  { %v13_v2 = vmul.f32 1.5707964, %v595_v1 }
   0xb   :  { %v628_v4 = vmul.f32 0.5, %v13_v2 }
   0xd   :  { %v18_v5 = vand.u32 2139095040, %v628_v4  ;;  %v15_v7 = vand.u32 2147483647, %v628_v4  ;;  %vm17_vm12 = vcmp.lt.s32.totalorder %v628_v4, 0 }
   0xf   :  { %v19_v6 = vshrl.u32 %v18_v5, 23  ;;  %v22_v10 = vand.u32 8388607, %v15_v7  ;;  %vm16_vm13 = vcmp.le.f32.partialorder %v15_v7, 0.7853982 }
  0x11   :  { %v561_v8 = vadd.s32 4294967169, %v19_v6  ;;  %v23_v13 = vor.u32 8388608, %v22_v10 }
  0x13   :  { %v25_v9 = vadd.s32 1, %v561_v8  ;;  %v637_v32 = vshll.u32 %v23_v13, 8 }
  0x15   :  { %vm26_vm0 = vcmp.gt.s32.totalorder %v25_v9, 0  ;;  %v64_v44 = vand.u32 65535, %v637_v32  ;;  %v65_v45 = vshrl.u32 %v637_v32, 16 }
  0x16   :  { %v27_v11 = vsel %vm26_vm0, %v25_v9, 0 }
  0x17   :  { %v29_v12 = vand.u32 31, %v27_v11  ;;  %v634_v14 = vshrl.u32 %v27_v11, 5 }
  0x19   :  { %v30_v15 = vsub.s32 32, %v29_v12  ;;  %v32_v17 = vshll.u32 %v597_v16, %v29_v12  ;;  %v35_v19 = vshll.u32 %v598_v18, %v29_v12  ;;  %v38_v21 = vshll.u32 %v599_v20, %v29_v12 }
  0x1a   :  { %v41_v23 = vshll.u32 %v600_v22, %v29_v12  ;;  %v44_v25 = vshll.u32 %v601_v24, %v29_v12  ;;  %vm47_vm1 = vcmp.lt.s32.totalorder %v634_v14, 1  ;;  %vm50_vm2 = vcmp.lt.s32.totalorder %v634_v14, 4 }
  0x1b   :  { %v33_v26 = vshrl.u32 %v598_v18, %v30_v15  ;;  %v36_v27 = vshrl.u32 %v599_v20, %v30_v15  ;;  %v39_v28 = vshrl.u32 %v600_v22, %v30_v15  ;;  %v42_v29 = vshrl.u32 %v601_v24, %v30_v15 }
  0x1c   :  { %v45_v31 = vshrl.u32 %v602_v30, %v30_v15  ;;  %vm49_vm3 = vcmp.lt.s32.totalorder %v634_v14, 3  ;;  %vm48_vm4 = vcmp.lt.s32.totalorder %v634_v14, 2  ;;  %v31_v52 = vshrl.u32 %v597_v16, %v30_v15 }
  0x1d   :  { %v34_v33 = vor.u32 %v33_v26, %v32_v17  ;;  %v37_v34 = vor.u32 %v36_v27, %v35_v19  ;;  %v40_v35 = vor.u32 %v39_v28, %v38_v21  ;;  %v43_v36 = vor.u32 %v42_v29, %v41_v23 }
  0x1e   :  { %v46_v37 = vor.u32 %v45_v31, %v44_v25 }
  0x1f   :  { %v55_v38 = vsel %vm47_vm1, %v34_v33, %v37_v34  ;;  %v59_v39 = vsel %vm47_vm1, %v37_v34, %v40_v35  ;;  %v56_v40 = vsel %vm50_vm2, %v43_v36, 920167782  ;;  %v51_v1 = vsel %vm47_vm1, %v31_v52, %v34_v33 }
  0x20   :  { %v60_v41 = vsel %vm50_vm2, %v46_v37, 1326507024  ;;  %v57_v42 = vsel %vm49_vm3, %v40_v35, %v56_v40  ;;  %v52_v5 = vsel %vm50_vm2, %v40_v35, 2102212464 }
  0x21   :  { %v61_v43 = vsel %vm49_vm3, %v43_v36, %v60_v41  ;;  %v58_v46 = vsel %vm48_vm4, %v55_v38, %v57_v42  ;;  %v53_v16 = vsel %vm49_vm3, %v37_v34, %v52_v5 }
  0x22   :  { %v62_v47 = vsel %vm48_vm4, %v59_v39, %v61_v43  ;;  %v88_v50 = vand.u32 65535, %v58_v46  ;;  %v89_v51 = vshrl.u32 %v58_v46, 16  ;;  %v54_v24 = vsel %vm48_vm4, %v51_v1, %v53_v16 }
  0x23   :  { %v66_v48 = vand.u32 65535, %v62_v47  ;;  %v67_v49 = vshrl.u32 %v62_v47, 16  ;;  %v108_v28 = vmul.u32 %v637_v32, %v54_v24  ;;  %vm158_vm4 = vweird.f32 %v628_v4 }
  0x24   :  { %v90_v56 = vmul.u32 %v88_v50, %v64_v44  ;;  %v91_v57 = vmul.u32 %v89_v51, %v64_v44  ;;  %v92_v58 = vmul.u32 %v88_v50, %v65_v45  ;;  %v93_v62 = vmul.u32 %v89_v51, %v65_v45 }
  0x25   :  { %v68_v53 = vmul.u32 %v66_v48, %v64_v44  ;;  %v69_v54 = vmul.u32 %v67_v49, %v64_v44  ;;  %v70_v55 = vmul.u32 %v66_v48, %v65_v45  ;;  %v71_v59 = vmul.u32 %v67_v49, %v65_v45 }
  0x26   :  { %v94_v63 = vshll.u32 %v91_v57, 16  ;;  %v96_v0 = vshll.u32 %v92_v58, 16  ;;  %v95_v13 = vshrl.u32 %v91_v57, 16  ;;  %v97_v20 = vshrl.u32 %v92_v58, 16 }
  0x27   :  { %v72_v60 = vshll.u32 %v69_v54, 16  ;;  %v74_v61 = vshll.u32 %v70_v55, 16  ;;  %v73_v9 = vshrl.u32 %v69_v54, 16  ;;  %v75_v17 = vshrl.u32 %v70_v55, 16 }
  0x28   :  { %vm98_vm6 = vc.u32 %v90_v56, %v94_v63  ;;  %v100_v8 = vadd.s32 %v94_v63, %v90_v56 }
  0x29   :  { %vm76_vm5 = vc.u32 %v68_v53, %v72_v60  ;;  %v78_v2 = vadd.s32 %v72_v60, %v68_v53  ;;  %v99_v11 = vsel %vm98_vm6, 1, %v596_v3  ;;  %v324_v60 = vlaneseq }
  0x2a   :  { %v77_v6 = vsel %vm76_vm5, 1, %v596_v3  ;;  %v101_v15 = vadd.s32 %v99_v11, %v93_v62  ;;  %vm102_vm8 = vc.u32 %v100_v8, %v96_v0  ;;  %v104_v23 = vadd.s32 %v100_v8, %v96_v0 }
  0x2b   :  { %v79_v10 = vadd.s32 %v77_v6, %v71_v59  ;;  %vm80_vm7 = vc.u32 %v78_v2, %v74_v61  ;;  %v103_v19 = vsel %vm102_vm8, 1, %v596_v3  ;;  %v325_v2 = vshrl.u32 %v324_v60, 7  ;;  %v383_v60 = vld [vmem:[%s754_s1 + $0x10] sm:$0xff] }
  0x2c   :  { %v81_v12 = vsel %vm80_vm7, 1, %v596_v3  ;;  %v105_v21 = vadd.s32 %v103_v19, %v101_v15 }
  0x2d   :  { %v83_v18 = vadd.s32 %v81_v12, %v79_v10  ;;  %v326_v11 = vadd.s32 8, %v325_v2 }
  0x2e   :  { %v106_v25 = vadd.s32 %v105_v21, %v95_v13  ;;  %v353_v21 = vand.u32 2, %v325_v2 }
  0x2f   :  { %v84_v22 = vadd.s32 %v83_v18, %v73_v9  ;;  %v354_v18 = vand.u32 2, %v326_v11  ;;  %v368_v19 = vand.u32 1, %v326_v11 }
  0x30   :  { %v107_v27 = vadd.s32 %v106_v25, %v97_v20  ;;  %v339_v20 = vand.u32 4, %v325_v2  ;;  %v367_v25 = vand.u32 1, %v325_v2 }
  0x31   :  { %v85_v26 = vadd.s32 %v84_v22, %v75_v17  ;;  %v340_v17 = vand.u32 4, %v326_v11  ;;  %vm684_vm6 = vcmp.ne.s32.totalorder %v354_v18, 0  ;;  %vm689_vm7 = vcmp.ne.s32.totalorder %v368_v19, 0 }
  0x32   :  { %v111_v29 = vadd.s32 1, %v107_v27  ;;  %vm341_vm8 = vcmp.ne.s32.totalorder %v339_v20, 0 }
  0x33   :  { %vm110_vm9 = vc.u32 %v85_v26, %v104_v23  ;;  %v109_v14 = vadd.s32 %v104_v23, %v85_v26  ;;  %vm680_vm5 = vcmp.ne.s32.totalorder %v340_v17, 0 }
  0x34   :  { %v112_v30 = vsel %vm110_vm9, %v111_v29, %v107_v27  ;;  %vm693_vm9 = vcmp.ne.s32.totalorder %v353_v21, 0 }
  0x35   :  { %v113_v31 = vadd.s32 %v112_v30, %v108_v28 }
  0x37   :  { %v114_v33 = vadd.s32 536870912, %v113_v31 }
  0x39   :  { %v115_v34 = vshrl.u32 %v114_v33, 30 }
  0x3b   :  { %v116_v35 = vshll.u32 %v115_v34, 30  ;;  %v139_v51 = vsub.s32 4, %v115_v34 }
  0x3d   :  { %v117_v3 = vsub.s32 %v113_v31, %v116_v35  ;;  %v140_v54 = vsel %vm17_vm12, %v139_v51, %v115_v34 }
  0x3e   :  { %v142_v57 = vsel %vm16_vm13, 0, %v140_v54  ;;  %v381_v54 = vld [vmem:[%s754_s1] sm:$0xff] }
  0x3f   :  { %vm118_vm10 = vcmp.lt.s32.totalorder %v117_v3, 0  ;;  %v119_v36 = vsub.s32 0, %v117_v3  ;;  %v313_v63 = vadd.s32 3, %v142_v57  ;;  %v159_v8 = vand.u32 3, %v142_v57  ;;  %v382_v57 = vld [vmem:[%s754_s1 + $0x8] sm:$0xff] }
  0x41   :  { %v120_v37 = vsel %vm118_vm10, %v119_v36, %v117_v3  ;;  %v314_v7 = vand.u32 3, %v313_v63  ;;  %vm160_vm14 = vcmp.lt.s32.totalorder %v159_v8, 2  ;;  %vm161_vm15 = vcmp.eq.s32.totalorder %v159_v8, 0 }
  0x42   :  { %v121_v38 = vclz %v120_v37  ;;  %vm164_vm0 = vcmp.eq.s32.totalorder %v159_v8, 2  ;;  %vm697_vm10 = vcmp.ne.s32.totalorder %v367_v25, 0 }
  0x43   :  { %vm316_vm1 = vcmp.eq.s32.totalorder %v314_v7, 0  ;;  %vm319_vm2 = vcmp.eq.s32.totalorder %v314_v7, 2  ;;  %vm315_vm3 = vcmp.lt.s32.totalorder %v314_v7, 2 }
  0x44   :  { %v562_v39 = vadd.s32 4294967294, %v121_v38 }
  0x46   :  { %vm563_vm11 = vcmp.lt.s32.totalorder %v562_v39, 0 }
  0x47   :  { %v124_v40 = vsel %vm563_vm11, 0, %v562_v39  ;;  %vm389_vm11 = vcmask 130048  }
  0x48   :  { %v125_v41 = vsub.s32 32, %v124_v40  ;;  %v126_v42 = vshll.u32 %v117_v3, %v124_v40  ;;  %v129_v43 = vsub.s32 4294967266, %v124_v40 }
  0x4a   :  { %v127_v32 = vshrl.u32 %v109_v14, %v125_v41  ;;  %v130_v44 = vadd.s32 127, %v129_v43 }
  0x4c   :  { %v128_v45 = vor.u32 %v127_v32, %v126_v42  ;;  %v131_v46 = vshll.u32 %v130_v44, 23 }
  0x4e   :  { %v132_v47 = vor.u32 4788187, %v131_v46  ;;  %v135_v48 = vcvt.s32.f32 %v128_v45 }
  0x50   :  { %v133_v49 = vand.u32 2147483647, %v132_v47 }
  0x52   :  { %v136_v50 = vmul.f32 %v135_v48, %v133_v49 }
  0x54   :  { %v137_v52 = vxor.u32 2147483648, %v136_v50 }
  0x56   :  { %v138_v53 = vsel %vm17_vm12, %v137_v52, %v136_v50  ;;  %vm491_vm12 = vcmask 1040384  }
  0x57   :  { %v141_v55 = vsel %vm16_vm13, %v628_v4, %v138_v53  ;;  %vm493_vm13 = vcmask 1041408  }
  0x58   :  { %v143_v56 = vmul.f32 %v141_v55, %v141_v55 }
  0x5a   :  { %v144_v58 = vmul.f32 -0.001358992, %v143_v56  ;;  %v151_v59 = vmul.f32 -0.00019511016, %v143_v56 }
  0x5c   :  { %v145_v61 = vadd.f32 0.041655596, %v144_v58  ;;  %v152_v62 = vadd.f32 0.008332121, %v151_v59  ;;  %v385_v58 = vld [vmem:[%s754_s1 + $0x20] sm:$0xff]  ;;  %v388_v59 = vld [vmem:[%s754_s1 + $0x38] sm:$0xff] }
  0x5e   :  { %v146_v0 = vmul.f32 %v145_v61, %v143_v56  ;;  %v153_v1 = vmul.f32 %v152_v62, %v143_v56  ;;  %v386_v61 = vld [vmem:[%s754_s1 + $0x28] sm:$0xff] }
  0x60   :  { %v147_v5 = vadd.f32 -0.4999988, %v146_v0  ;;  %v154_v6 = vadd.f32 -0.16666654, %v153_v1 }
  0x62   :  { %v148_v9 = vmul.f32 %v147_v5, %v143_v56  ;;  %v155_v10 = vmul.f32 %v154_v6, %v143_v56  ;;  %v387_v56 = vld [vmem:[%s754_s1 + $0x30] sm:$0xff] }
  0x64   :  { %v149_v12 = vadd.f32 1.0, %v148_v9  ;;  %v156_v13 = vadd.f32 1.0, %v155_v10 }
  0x66   :  { %v157_v15 = vmul.f32 %v156_v13, %v141_v55  ;;  %v165_v16 = vxor.u32 2147483648, %v149_v12  ;;  %v384_v55 = vld [vmem:[%s754_s1 + $0x18] sm:$0xff] }
  0x68   :  { %v162_v22 = vxor.u32 2147483648, %v157_v15  ;;  %v166_v23 = vsel %vm164_vm0, %v165_v16, %v157_v15  ;;  %v321_v24 = vsel %vm319_vm2, %v165_v16, %v157_v15  ;;  %vm555_vm0 = vcmask 10240  }
  0x6a   :  { %v163_v26 = vsel %vm161_vm15, %v149_v12, %v162_v22  ;;  %v318_v27 = vsel %vm316_vm1, %v149_v12, %v162_v22  ;;  %vm522_vm15 = vcmask 1043456  }
  0x6b   :  { %v167_v30 = vsel %vm160_vm14, %v163_v26, %v166_v23  ;;  %v322_v31 = vsel %vm315_vm3, %v318_v27, %v321_v24  ;;  %vm495_vm14 = vcmask 1042432  }
  0x6c   :  { %v168_v4 = vsel %vm158_vm4, nan, %v167_v30  ;;  %v323_v34 = vsel %vm158_vm4, nan, %v322_v31 }
  0x6d   :  { %v335_v36 = vperm.slane %v323_v34, 0  ;;  %v347_v37 = vperm.slane %v323_v34, 1  ;;  %v348_v38 = vperm.slane %v168_v4, 1  ;;  %v361_v39 = vperm.slane %v323_v34, 2 }
  0x6e   :  { %v362_v14 = vperm.slane %v168_v4, 2  ;;  %v375_v40 = vperm.slane %v323_v34, 3  ;;  %v376_v41 = vperm.slane %v168_v4, 3  ;;  %v336_v42 = vperm.slane %v168_v4, 0 }
  0x6f   :  { %v350_v43 = vsel %vm680_vm5, %v347_v37, %v348_v38  ;;  %v349_v32 = vsel %vm341_vm8, %v347_v37, %v348_v38 }
  0x70   :  { %v352_v44 = vmul.f32 %v350_v43, %v335_v36  ;;  %v364_v45 = vsel %vm684_vm6, %v361_v39, %v362_v14  ;;  %v351_v46 = vmul.f32 %v349_v32, %v336_v42  ;;  %v378_v47 = vsel %vm689_vm7, %v375_v40, %v376_v41 }
  0x71   :  { %v363_v48 = vsel %vm693_vm9, %v361_v39, %v362_v14  ;;  %v377_v49 = vsel %vm697_vm10, %v375_v40, %v376_v41 }
  0x72   :  { %v366_v50 = vmul.f32 %v364_v45, %v352_v44  ;;  %v365_v51 = vmul.f32 %v363_v48, %v351_v46 }
  0x74   :  { %v380_v52 = vmul.f32 %v378_v47, %v366_v50  ;;  %v379_v53 = vmul.f32 %v377_v49, %v365_v51 }
  0x76   :  { %428 = vmatpush.msra.mxu0 %v380_v52  ;;  %576 = vmatpush.msra.mxu2 %v380_v52 }
  0x77   :  { %577 = vmatpush.msra.mxu3 %v380_v52 }
  0x78   :  { %429 = vmatpush.msra.mxu0 %v379_v53  ;;  %578 = vmatpush.msra.mxu2 %v379_v53 }
  0x79   :  { %579 = vmatpush.msra.mxu3 %v379_v53  ;;  %567 = vmatmul.msk.f32.vlgmr.msra.gmra.mxu0 %vm389_vm11, %v381_v54 }
  0x7a   :  { %570 = vmatmul.msk.f32.vlgmr.msra.gmra.mxu2 %vm389_vm11, %v384_v55  ;;  %573 = vmatmul.msk.f32.vlgmr.msra.gmra.mxu3 %vm389_vm11, %v387_v56 }
  0x81   :  { %568 = vmatmul.msk.f32.gmra.mxu0 %vm389_vm11, %v382_v57 }
  0x82   :  { %571 = vmatmul.msk.f32.gmra.mxu2 %vm389_vm11, %v385_v58  ;;  %574 = vmatmul.msk.f32.gmra.mxu3 %vm389_vm11, %v388_v59  ;;  %v525_v58 = vld [vmem:[%s754_s1 + $0x40] sm:$0x7] }
  0x89   :  { %569 = vmatmul.msk.f32.gmra.mxu0 %vm389_vm11, %v383_v60 }
  0x8a   :  { %572 = vmatmul.msk.f32.gmra.mxu2 %vm389_vm11, %v386_v61 }
  0xf6   :  { %v431_v62 = vpop.f32.mrf.mxu0 }
  0xf7   :  { %v455_v5 = vmul.f32 %v431_v62, %v379_v53 }
  0xfd   :  { %v440_v63 = vpop.f32.mrf.mxu2  ;;  %v449_v0 = vpop.f32.mrf.mxu3 }
  0xfe   :  { %v434_v1 = vpop.f32.mrf.mxu0  ;;  %v482_v8 = vmul.f32 %v449_v0, %v379_v53  ;;  %v465_v12 = vmul.f32 %v440_v63, %v380_v52 }
  0xff   :  { %v456_v2 = vmul.f32 %v434_v1, %v380_v52 }
 0x101   :  { %v457_v6 = vadd.f32 %v456_v2, %v455_v5 }
 0x103   :  { %v458_v13 = vrot.slane %v457_v6, 4 }
 0x105   :  { %v443_v7 = vpop.f32.mrf.mxu2  ;;  %v452_v9 = vpop.f32.mrf.mxu3  ;;  %v459_v19 = vadd.f32 %v458_v13, %v457_v6 }
 0x106   :  { %v483_v10 = vmul.f32 %v452_v9, %v380_v52  ;;  %v437_v11 = vpop.f32.mrf.mxu0  ;;  %v473_v24 = vmul.f32 %v443_v7, %v379_v53 }
 0x107   :  { %v464_v15 = vmul.f32 %v437_v11, %v379_v53  ;;  %v460_v26 = vrot.slane %v459_v19, 2  ;;  %v526_v53 = vld [vmem:[%s754_s1 + $0x48] sm:$0x7] }
 0x108   :  { %v484_v16 = vadd.f32 %v483_v10, %v482_v8 }
 0x109   :  { %v466_v17 = vadd.f32 %v465_v12, %v464_v15  ;;  %v461_v33 = vadd.f32 %v460_v26, %v459_v19 }
 0x10a   :  { %v485_v18 = vrot.slane %v484_v16, 4 }
 0x10b   :  { %v467_v20 = vrot.slane %v466_v17, 4  ;;  %v462_v36 = vrot.slane %v461_v33, 1 }
 0x10c   :  { %v486_v21 = vadd.f32 %v485_v18, %v484_v16 }
 0x10d   :  { %v468_v22 = vadd.f32 %v467_v20, %v466_v17  ;;  %v446_v23 = vpop.f32.mrf.mxu2  ;;  %v463_v40 = vadd.f32 %v462_v36, %v461_v33 }
 0x10e   :  { %v474_v25 = vmul.f32 %v446_v23, %v380_v52  ;;  %v487_v29 = vrot.slane %v486_v21, 2 }
 0x10f   :  { %v469_v27 = vrot.slane %v468_v22, 2 }
 0x110   :  { %v475_v28 = vadd.f32 %v474_v25, %v473_v24  ;;  %v488_v34 = vadd.f32 %v487_v29, %v486_v21 }
 0x111   :  { %v470_v30 = vadd.f32 %v469_v27, %v468_v22 }
 0x112   :  { %v476_v31 = vrot.slane %v475_v28, 4  ;;  %v489_v38 = vrot.slane %v488_v34, 1 }
 0x113   :  { %v471_v35 = vrot.slane %v470_v30, 1 }
 0x114   :  { %v477_v4 = vadd.f32 %v476_v31, %v475_v28  ;;  %v490_v42 = vadd.f32 %v489_v38, %v488_v34 }
 0x115   :  { %v472_v39 = vadd.f32 %v471_v35, %v470_v30 }
 0x116   :  { %v478_v3 = vrot.slane %v477_v4, 2 }
 0x117   :  { %v492_v43 = vsel %vm491_vm12, %v463_v40, %v472_v39 }
 0x118   :  { %v479_v37 = vadd.f32 %v478_v3, %v477_v4 }
 0x11a   :  { %v480_v14 = vrot.slane %v479_v37, 1 }
 0x11c   :  { %v481_v41 = vadd.f32 %v480_v14, %v479_v37 }
 0x11e   :  { %v494_v32 = vsel %vm493_vm13, %v492_v43, %v481_v41 }
 0x11f   :  { %v496_v44 = vsel %vm495_vm14, %v494_v32, %v490_v42 }
 0x120   :  { %v497_v45 = vmax.f32 %v496_v44, 0.0 }
 0x122   :  { %507 = vrot.lane.b32.xlu1 %v497_v45, %s603_s26  ;;  %499 = vrot.lane.b32.xlu0 %v497_v45, %s604_s27 }
 0x12a   :  { %503 = vrot.lane.b32.xlu0 %v497_v45, %s605_s28 }
 0x132   :  { %529 = vperm.xlu0 %593, %v526_v53  }
 0x194   :  { %v500_v46 = vpop.permute.xlu0 %499  ;;  %v508_v50 = vpop.permute.xlu1 %507 }
 0x195   :  { %v502_v47 = vmax.f32 %v497_v45, %v500_v46 }
 0x19c   :  { %v504_v48 = vpop.permute.xlu0 %503 }
 0x19d   :  { %v506_v49 = vmax.f32 %v502_v47, %v504_v48 }
 0x19f   :  { %v510_v51 = vmax.f32 %v506_v49, %v508_v50 }
 0x1a1   :  { %516 = vrot.lane.b32.xlu1 %v510_v51, %s606_s29  ;;  %v512_v52 = vrot.slane %v510_v51, 4 }
 0x1a3   :  { %519 = vrot.lane.b32.xlu2 %v512_v52, %s607_s30 }
 0x1a4   :  { %v530_v60 = vpop.permute.xlu0 %529 }
 0x1ab   :  { %513 = vrot.lane.b32.xlu2 %v512_v52, %s608_s3 }
 0x1fd   :  { %v520_v54 = vpop.permute.xlu2 %519 }
 0x205   :  { %v514_v55 = vpop.permute.xlu2 %513 }
 0x206   :  { %v523_v59 = vsel %vm522_vm15, %v510_v51, %v514_v55 }
 0x213   :  { %v517_v56 = vpop.permute.xlu1 %516 }
 0x214   :  { %v524_v57 = vsel %vm522_vm15, %v517_v56, %v520_v54 }
 0x215   :  { %549 = vmatpush.msra.mxu1 %v524_v57 }
 0x217   :  { %550 = vmatpush.msra.mxu1 %v523_v59 }
 0x218   :  { %575 = vmatmul.msk.f32.vlgmr.msra.gmra.mxu1 %vm389_vm11, %v525_v58 }
 0x295   :  { %v552_v61 = vpop.f32.mrf.mxu1 }
 0x296   :  { %v553_v62 = vadd.f32 %v552_v61, %v530_v60 }
 0x298   :  { %556 = vst.msk [vmem:[%s755_s2] sm:$0x7] %vm555_vm0, %v553_v62 }

</bundles_post_ra>
